<compile_context>
chip_gen: v5e
topology: v5e:2x2
jax: 0.10.0
libtpu: 0.0.40
codegen_flags: <defaults>
</compile_context>

<pallas_src>
import jax
import jax.numpy as jnp
from jax.experimental import pallas as pl
from jax.experimental.pallas import tpu as pltpu

LANE = 128  # lane width: pad final output dim to a multiple of this


# ----------------------------- Pallas kernel -------------------------------

def make_fused_fnn_kernel(num_hidden):
    """Kernel computing the whole MLP chain for one batch tile.

    Ref layout: (x, w0, b0, w1, b1, ..., w_final, b_final, out).
    Hidden layers: bf16 matmul (f32 accum) + f32 bias + ReLU.  Final layer:
    bf16 matmul (f32 accum) + f32 bias, no activation (matches FNN with
    use_relu=True, use_bnorm=False, dropout=0).
    """

    def kernel(*refs):
        x_ref = refs[0]
        out_ref = refs[-1]
        y = x_ref[...].astype(jnp.float32)               # (TB, in_features)
        idx = 1
        for _ in range(num_hidden):
            w = refs[idx][...]                           # bf16 (in, out)
            b = refs[idx + 1][...]                       # f32  (1, out)
            idx += 2
            acc = jnp.dot(y.astype(jnp.bfloat16), w,
                          preferred_element_type=jnp.float32)
            y = jnp.maximum(acc + b, 0.0)                # f32 VPU path
        w = refs[idx][...]                               # bf16, lane-padded
        b = refs[idx + 1][...]                           # f32, lane-padded
        out_ref[...] = jnp.dot(y.astype(jnp.bfloat16), w,
                               preferred_element_type=jnp.float32) + b

    return kernel


# ------------------------------ wrapper -------------------------------------

def simple_nn_forward(x, params, *, tile_b=256):
    """Fused forward pass of `simpleNN` as a single batch-tiled pallas_call."""
    hidden = params["hidden"]
    w_fin, b_fin = params["final"]          # lane-padded to a multiple of 128
    out_cols = params["out_cols"]           # true (unpadded) output width

    B, in_f = x.shape
    n_tiles = pl.cdiv(B, tile_b)
    b_pad = n_tiles * tile_b
    if b_pad != B:
        x = jnp.pad(x, ((0, b_pad - B), (0, 0)))  # rows independent -> safe

    flat_inputs = [x]
    for (w, b) in hidden:
        flat_inputs += [w, b]
    flat_inputs += [w_fin, b_fin]

    n_out_pad = w_fin.shape[1]              # lane-dense store width (128)

    # x/out tiled along the batch axis; weights & biases use constant
    # index_maps (same block every step) so they remain VMEM-resident.
    in_specs = [pl.BlockSpec((tile_b, in_f), lambda i: (i, 0))]
    for a in flat_inputs[1:]:
        in_specs.append(pl.BlockSpec(a.shape, lambda i: (0, 0)))
    out_spec = pl.BlockSpec((tile_b, n_out_pad), lambda i: (i, 0))

    # Advisory cost hint so XLA overlaps this small call with its neighbors.
    flops = 0
    cur = in_f
    for (w, _) in hidden:
        flops += 2 * b_pad * cur * int(w.shape[1])
        cur = int(w.shape[1])
    flops += 2 * b_pad * cur * n_out_pad
    bytes_accessed = sum(int(a.size) * a.dtype.itemsize for a in flat_inputs)
    bytes_accessed += b_pad * n_out_pad * 4

    out_padded = pl.pallas_call(
        make_fused_fnn_kernel(len(hidden)),
        out_shape=jax.ShapeDtypeStruct((b_pad, n_out_pad), jnp.float32),
        grid=(n_tiles,),
        in_specs=in_specs,
        out_specs=out_spec,
        compiler_params=pltpu.CompilerParams(
            dimension_semantics=("parallel",),      # shards across v7x's 2 TCs
            vmem_limit_bytes=32 * 1024 * 1024,      # explicit guard (v7x: 64MiB phys)
        ),
        cost_estimate=pl.CostEstimate(
            flops=flops, transcendentals=0, bytes_accessed=bytes_accessed),
    )(*flat_inputs)

    return out_padded[:B, :out_cols]


# ------------------------- deterministic parameters -------------------------

def init_params(key, input_shape, output_shape, dec_speed, lane_pad=LANE):
    """Mirror FNN.__init__ layer construction and PyTorch Linear init.

    Weights are stored pre-transposed (in, out) in bf16 (MXU operands);
    biases stay f32.  The final layer is zero-padded to `lane_pad` output
    columns so the kernel's store is lane-dense.
    """
    hidden = []
    ki = iter(jax.random.split(key, 64))
    in_f = input_shape
    t = dec_speed
    while in_f >= t * t * output_shape:
        out_f = in_f // t
        k = 1.0 / float(in_f) ** 0.5
        w = jax.random.uniform(next(ki), (in_f, out_f),
                               minval=-k, maxval=k, dtype=jnp.float32)
        b = jax.random.uniform(next(ki), (1, out_f),
                               minval=-k, maxval=k, dtype=jnp.float32)
        hidden.append((w.astype(jnp.bfloat16), b))
        in_f = out_f
    k = 1.0 / float(in_f) ** 0.5
    w = jax.random.uniform(next(ki), (in_f, output_shape),
                           minval=-k, maxval=k, dtype=jnp.float32)
    b = jax.random.uniform(next(ki), (1, output_shape),
                           minval=-k, maxval=k, dtype=jnp.float32)
    n_pad = ((output_shape + lane_pad - 1) // lane_pad) * lane_pad
    w_p = jnp.zeros((in_f, n_pad), jnp.float32).at[:, :output_shape].set(w)
    b_p = jnp.zeros((1, n_pad), jnp.float32).at[:, :output_shape].set(b)
    return {"hidden": hidden,
            "final": (w_p.astype(jnp.bfloat16), b_p),
            "out_cols": output_shape}


# ------------------------------ pure-JAX reference --------------------------

def simple_nn_ref(x, params):
    """Reference with identical numerics (bf16 matmul operands, f32 accum)."""
    y = x.astype(jnp.float32)
    for (w, b) in params["hidden"]:
        y = jnp.maximum(
            jnp.dot(y.astype(jnp.bfloat16), w,
                    preferred_element_type=jnp.float32) + b, 0.0)
    w, b = params["final"]
    y = jnp.dot(y.astype(jnp.bfloat16), w,
                preferred_element_type=jnp.float32) + b
    return y[:, :params["out_cols"]]


# ---------------------------------- main ------------------------------------

if __name__ == "__main__":
    BATCH = 512          # 2 batch tiles of 256 -> exercises the pipelined grid
    INPUT_SHAPE = 256
    OUTPUT_SHAPE = 4
    DEC_SPEED = 4
    # Layer plan (dec_speed=4): 256 -> 64 (ReLU) -> 16 (ReLU) -> 4

    key = jax.random.PRNGKey(0)
    k_x, k_p = jax.random.split(key)
    x = jax.random.normal(k_x, (BATCH, INPUT_SHAPE), dtype=jnp.float32)
    params = init_params(k_p, INPUT_SHAPE, OUTPUT_SHAPE, DEC_SPEED)

    out = jax.block_until_ready(simple_nn_forward(x, params, tile_b=256))
    ref = jax.block_until_ready(simple_nn_ref(x, params))

    assert out.shape == (BATCH, OUTPUT_SHAPE), out.shape
    assert bool(jnp.all(jnp.isfinite(out)))
    max_err = float(jnp.max(jnp.abs(out - ref)))
    assert bool(jnp.allclose(out, ref, atol=5e-3, rtol=5e-3)), max_err
    print("KERNEL_OK")
</pallas_src>

<mosaic_0001>
module attributes {stable_mosaic.version = 11 : i64} {
  func.func @kernel(%arg0: i32, %arg1: memref<256x256xf32, #tpu.memory_space<vmem>>, %arg2: memref<256x64xbf16, #tpu.memory_space<vmem>>, %arg3: memref<1x64xf32, #tpu.memory_space<vmem>>, %arg4: memref<64x16xbf16, #tpu.memory_space<vmem>>, %arg5: memref<1x16xf32, #tpu.memory_space<vmem>>, %arg6: memref<16x128xbf16, #tpu.memory_space<vmem>>, %arg7: memref<1x128xf32, #tpu.memory_space<vmem>>, %arg8: memref<256x128xf32, #tpu.memory_space<vmem>>) attributes {dimension_semantics = [#tpu.dimension_semantics<parallel>], iteration_bounds = array<i64: 2>, scalar_prefetch = 0 : i64, scratch_operands = 0 : i64, tpu.core_type = #tpu.core_type<tc>, window_params = [{transform_indices = @transform_0, window_bounds = array<i64: 256, 256>}, {pipeline_mode = #tpu.pipeline_mode<synchronous>, transform_indices = @transform_1, window_bounds = array<i64: 256, 64>}, {pipeline_mode = #tpu.pipeline_mode<synchronous>, transform_indices = @transform_2, window_bounds = array<i64: 1, 64>}, {pipeline_mode = #tpu.pipeline_mode<synchronous>, transform_indices = @transform_3, window_bounds = array<i64: 64, 16>}, {pipeline_mode = #tpu.pipeline_mode<synchronous>, transform_indices = @transform_4, window_bounds = array<i64: 1, 16>}, {pipeline_mode = #tpu.pipeline_mode<synchronous>, transform_indices = @transform_5, window_bounds = array<i64: 16, 128>}, {pipeline_mode = #tpu.pipeline_mode<synchronous>, transform_indices = @transform_6, window_bounds = array<i64: 1, 128>}, {transform_indices = @transform_7, window_bounds = array<i64: 256, 128>}]} {
    %c0 = arith.constant 0 : index
    %c0_0 = arith.constant 0 : index
    %0 = vector.load %arg1[%c0, %c0_0] : memref<256x256xf32, #tpu.memory_space<vmem>>, vector<256x256xf32>
    %c0_1 = arith.constant 0 : index
    %c0_2 = arith.constant 0 : index
    %1 = vector.load %arg2[%c0_1, %c0_2] : memref<256x64xbf16, #tpu.memory_space<vmem>>, vector<256x64xbf16>
    %c0_3 = arith.constant 0 : index
    %c0_4 = arith.constant 0 : index
    %2 = vector.load %arg3[%c0_3, %c0_4] : memref<1x64xf32, #tpu.memory_space<vmem>>, vector<1x64xf32>
    %3 = arith.truncf %0 : vector<256x256xf32> to vector<256x256xbf16>
    %cst = arith.constant dense<0.000000e+00> : vector<256x64xf32>
    %4 = tpu.matmul %3, %1, %cst {dimension_numbers = #tpu.dot_dimension_numbers<[1], [0], [0], [1], [0, 0, 1, 1], [], []>} : vector<256x256xbf16>, vector<256x64xbf16>, vector<256x64xf32> -> vector<256x64xf32>
    %5 = vector.broadcast %2 : vector<1x64xf32> to vector<256x64xf32>
    %6 = arith.addf %4, %5 : vector<256x64xf32>
    %cst_5 = arith.constant 0.000000e+00 : f32
    %7 = vector.broadcast %cst_5 : f32 to vector<256x64xf32>
    %8 = arith.maximumf %6, %7 : vector<256x64xf32>
    %c0_6 = arith.constant 0 : index
    %c0_7 = arith.constant 0 : index
    %9 = vector.load %arg4[%c0_6, %c0_7] : memref<64x16xbf16, #tpu.memory_space<vmem>>, vector<64x16xbf16>
    %c0_8 = arith.constant 0 : index
    %c0_9 = arith.constant 0 : index
    %10 = vector.load %arg5[%c0_8, %c0_9] : memref<1x16xf32, #tpu.memory_space<vmem>>, vector<1x16xf32>
    %11 = arith.truncf %8 : vector<256x64xf32> to vector<256x64xbf16>
    %cst_10 = arith.constant dense<0.000000e+00> : vector<256x16xf32>
    %12 = tpu.matmul %11, %9, %cst_10 {dimension_numbers = #tpu.dot_dimension_numbers<[1], [0], [0], [1], [0, 0, 1, 1], [], []>} : vector<256x64xbf16>, vector<64x16xbf16>, vector<256x16xf32> -> vector<256x16xf32>
    %13 = vector.broadcast %10 : vector<1x16xf32> to vector<256x16xf32>
    %14 = arith.addf %12, %13 : vector<256x16xf32>
    %cst_11 = arith.constant 0.000000e+00 : f32
    %15 = vector.broadcast %cst_11 : f32 to vector<256x16xf32>
    %16 = arith.maximumf %14, %15 : vector<256x16xf32>
    %c0_12 = arith.constant 0 : index
    %c0_13 = arith.constant 0 : index
    %17 = vector.load %arg6[%c0_12, %c0_13] : memref<16x128xbf16, #tpu.memory_space<vmem>>, vector<16x128xbf16>
    %c0_14 = arith.constant 0 : index
    %c0_15 = arith.constant 0 : index
    %18 = vector.load %arg7[%c0_14, %c0_15] : memref<1x128xf32, #tpu.memory_space<vmem>>, vector<1x128xf32>
    %19 = arith.truncf %16 : vector<256x16xf32> to vector<256x16xbf16>
    %cst_16 = arith.constant dense<0.000000e+00> : vector<256x128xf32>
    %20 = tpu.matmul %19, %17, %cst_16 {dimension_numbers = #tpu.dot_dimension_numbers<[1], [0], [0], [1], [0, 0, 1, 1], [], []>} : vector<256x16xbf16>, vector<16x128xbf16>, vector<256x128xf32> -> vector<256x128xf32>
    %21 = vector.broadcast %18 : vector<1x128xf32> to vector<256x128xf32>
    %22 = arith.addf %20, %21 : vector<256x128xf32>
    %c0_17 = arith.constant 0 : index
    %c0_18 = arith.constant 0 : index
    %23 = vector.load %arg8[%c0_17, %c0_18] : memref<256x128xf32, #tpu.memory_space<vmem>>, vector<256x128xf32>
    tpu.vector_store %arg8[%c0_17, %c0_18], %22 {strides = array<i32>} : memref<256x128xf32, #tpu.memory_space<vmem>>, vector<256x128xf32>,
    return
  }
  func.func @transform_0(%arg0: i32) -> (i32, i32) {
    %c0_i32 = arith.constant 0 : i32
    %c0_i32_0 = arith.constant 0 : i32
    return %arg0, %c0_i32 : i32, i32
  }
  func.func @transform_1(%arg0: i32) -> (i32, i32) {
    %c0_i32 = arith.constant 0 : i32
    %c0_i32_0 = arith.constant 0 : i32
    %c0_i32_1 = arith.constant 0 : i32
    return %c0_i32, %c0_i32_0 : i32, i32
  }
  func.func @transform_2(%arg0: i32) -> (i32, i32) {
    %c0_i32 = arith.constant 0 : i32
    %c0_i32_0 = arith.constant 0 : i32
    %c0_i32_1 = arith.constant 0 : i32
    return %c0_i32, %c0_i32_0 : i32, i32
  }
  func.func @transform_3(%arg0: i32) -> (i32, i32) {
    %c0_i32 = arith.constant 0 : i32
    %c0_i32_0 = arith.constant 0 : i32
    %c0_i32_1 = arith.constant 0 : i32
    return %c0_i32, %c0_i32_0 : i32, i32
  }
  func.func @transform_4(%arg0: i32) -> (i32, i32) {
    %c0_i32 = arith.constant 0 : i32
    %c0_i32_0 = arith.constant 0 : i32
    %c0_i32_1 = arith.constant 0 : i32
    return %c0_i32, %c0_i32_0 : i32, i32
  }
  func.func @transform_5(%arg0: i32) -> (i32, i32) {
    %c0_i32 = arith.constant 0 : i32
    %c0_i32_0 = arith.constant 0 : i32
    %c0_i32_1 = arith.constant 0 : i32
    return %c0_i32, %c0_i32_0 : i32, i32
  }
  func.func @transform_6(%arg0: i32) -> (i32, i32) {
    %c0_i32 = arith.constant 0 : i32
    %c0_i32_0 = arith.constant 0 : i32
    %c0_i32_1 = arith.constant 0 : i32
    return %c0_i32, %c0_i32_0 : i32, i32
  }
  func.func @transform_7(%arg0: i32) -> (i32, i32) {
    %c0_i32 = arith.constant 0 : i32
    %c0_i32_0 = arith.constant 0 : i32
    return %arg0, %c0_i32 : i32, i32
  }
}

</mosaic_0001>

<bundles_post_ra>
// kernel: tpu_custom_call.1
= control target key start
LH: loop header
LB: loop body
LE: loop exit
PB: predicated region body
PF: predicated region fallthrough
CT: control target
= control target key end

     0   :  { %12 = vsyncpa [#allocation3], 0  ;;  %s2035_s0 = inlined_call_operand.hbm [shape: f32[512,256], index: 0, kind: input, shape index: {}]   ;;  %s2036_s1 = inlined_call_operand.vmem [shape: bf16[256,64], index: 1, kind: input, shape index: {}]   ;;  %s2037_s2 = inlined_call_operand.vmem [shape: f32[1,64], index: 2, kind: input, shape index: {}]   ;;  %s2038_s3 = inlined_call_operand.vmem [shape: bf16[64,16], index: 3, kind: input, shape index: {}]   ;;  %s2039_s4 = inlined_call_operand.vmem [shape: f32[1,16], index: 4, kind: input, shape index: {}]   ;;  %s2040_s5 = inlined_call_operand.vmem [shape: bf16[16,128], index: 5, kind: input, shape index: {}]   ;;  %s2041_s6 = inlined_call_operand.vmem [shape: f32[1,128], index: 6, kind: input, shape index: {}]   ;;  %s2042_s7 = inlined_call_operand.hbm [shape: f32[512,128], index: 7, kind: output, shape index: {}]  }
   0x1   :  { %14 = vsyncpa [#allocation3 + $0x1], 0 }
   0x2   :  { %15 = vsyncpa [#allocation4], 0 }
   0x3   :  { %17 = vsyncpa [#allocation4 + $0x1], 0  ;;  %s1600_s24 = smov 0   ;;  %s1602_s25 = smov 0  }
   0x4   :  { %s1604_s26 = smov 0   ;;  %s1606_s27 = smov 0  }
   0x5 LB: > { %s1621_s28 = sadd.s32 4294967295, %s1554_s27   ;;  %s1250_s29 = sadd.s32 4294967294, %s1554_s27   ;;  %s1554_s27 = sphi %s1606_s27, %s2054_s27   ;;  %s1550_s26 = sphi %s1604_s26, %s2053_s26   ;;  %s1546_s25 = sphi %s1602_s25, %s2052_s25   ;;  %s1542_s24 = sphi %s1600_s24, %s2051_s24  }
   0x6   : > { %s1625_s30 = sadd.s32 1, %s1554_s27   ;;  %s30_s8 = sadd.s32 1, %s1550_s26 }
   0x7   : > { %s27_s9 = ssub.s32 %s1554_s27, %s1625_s30  ;;  %p37_p0 = scmp.ne.s32.totalorder %s1550_s26, %s1546_s25 }
   0x8   : > { %p28_p1 = scmp.eq.s32.totalorder %s27_s9, 0  ;;  %p38_p2 = scmp.eq.s32.totalorder %s1554_s27, 0 }
   0x9   : > { %p43_p3 = scmp.ne.s32.totalorder %s1546_s25, %s1542_s24  ;;  %p44_p4 = scmp.eq.s32.totalorder %s1621_s28, 0 }
   0xa   : > { %s1637_s10 = scalar_select %p28_p1, %s1550_s26, %s30_s8  }
   0xb   : > { %p1639_p5 = por %p38_p2, %p37_p0  ;;  %p1643_p6 = por %p44_p4, %p43_p3 }
   0xc   : > { %2043 = sst [smem:[#allocation8_spill]] %s1637_s10  ;;  %p193_p7 = scmp.eq.s32.totalorder %s1621_s28, 1 }
   0xd   : > { %p199_p8 = scmp.eq.s32.totalorder %s1250_s29, 1  ;;  %p1417_p10 = scmp.lt.s32.totalorder %s1554_s27, 2 }
   0xe   : > { %p1650_p11 = por %p193_p7, %p37_p0  ;;  %s237_s15 = sand.u32 1, %s1550_s26  }
   0xf   : > { %p1654_p12 = por %p199_p8, %p43_p3  ;;  %s1382_s16 = sshll.u32 %s1554_s27, 9 }
  0x10   : > { %s1253_s17 = sshll.u32 %s237_s15, 9  ;;  %s247_s20 = scalar_lea.hbm %s2035_s0, %s1382_s16 }
  0x11   : > { %s248_s21 = sshll.u32 %s247_s20, 4  ;;  %s241_s22 = scalar_lea.vmem [#allocation2], %s1253_s17  ;;  %s249_s21 = int_to_ptr.hbm [resolvable:$true] %s248_s21 }
  0x12   : > { %s250_s23 = sshll.u32 %s241_s22, 4  ;;  %p1665_p13 = pnand %p1417_p10, %p1639_p5  ;;  %s251_s23 = int_to_ptr.vmem [resolvable:$true] %s250_s23 }
  0x13   : > { %p1257_p0 = scmp.ge.s32.totalorder %s1554_s27, 1  ;;  %p258_p1 = scmp.lt.s32.totalorder %s1554_s27, 3 }
  0x14   : > { %s238_s8 = scalar_lea.sflag [#allocation3], %s237_s15  ;;  %s1458_s9 = sshra.s32 %s249_s21, 4  ;;  %s1459_s9 = int_to_ptr.hbm [resolvable:$true] %s1458_s9 }
  0x15   : > { %s1460_s10 = scalar_lea.hbm %s1459_s9, 512  ;;  %p1462_p3 = pneg %p1665_p13 }
  0x16   : > { %p1461_p2 = scmp.ne.s32.totalorder %s1459_s9, %s1460_s10  ;;  %s1465_s11 = scalar_lea.hbm %s2035_s0, 1024 }
  0x17   : > { %p1466_p5 = scmp.lt.s32.totalorder %s1459_s9, %s2035_s0  ;;  %p1467_p8 = scmp.lt.s32.totalorder %s1465_s11, %s1460_s10 }
  0x18   : > { %p1463_p4 = pnand %p1462_p3, %p1461_p2 }
  0x19   : > { %p1468_p10 = por %p1467_p8, %p1466_p5 }
  0x1a   : > { %p1464_p7 = pneg %p1463_p4 }
  0x1c   : > { %p1469_p9 = pnand %p1468_p10, %p1464_p7 }
  0x1e   : > { %1472 = shalt.err (!%p1469_p9)
}
  0x1f   : > { %s1556_s15 = smov 256   ;;  %s1557_s20 = smov 16  }
  0x20   : > { %1412 = dma.hbm_to_vmem [thread:$0]  (!%p1665_p13), %s249_s21, 8192, %s251_s23, %s238_s8, %s1556_s15, %s1556_s15, %s1557_s20  }
  0x21   : > { %p259_p2 = pnand %p1257_p0, %p258_p1 }
  0x22   : > { %s1686_s22 = sand.u32 (!%p259_p2), 1, %s1546_s25  }
  0x23   : > { %262 = sbr.rel (%p259_p2) target bundleno = 747 (0x2eb), region = 48  ;;  %s1258_s10 = sshll.u32 (!%p259_p2), %s1686_s22, 9 }
  0x24   : > { %s265_s9 = scalar_lea.sflag (!%p259_p2), [#allocation3], %s1686_s22  ;;  %s1690_s16 = scalar_lea.vmem (!%p259_p2), [#allocation2], %s1258_s10 }
  0x28   : > { %1533 = dma.done.wait (%p1643_p6), %s265_s9, 8192  }
  0x29   : > { %1535 = vsyncadd (%p1643_p6), %s265_s9, 4294959104  ;;  %v1390_v0 = vld [vmem:[%s2036_s1 + $0x38] sm:$0xff]  ;;  %v1389_v2 = vld [vmem:[%s2036_s1 + $0x30] sm:$0xff]  ;;  %vm793_vm0 = vcmask 523264   ;;  %vm991_vm1 = vcmask 130048   ;;  %s1259_s18 = sshll.u32 %s1686_s22, 8 }
  0x2a   : > { %v1398_v1 = vld [vmem:[%s2036_s1 + $0x78] sm:$0xff]  ;;  %531 = vmatpush.bf16.msra.mxu0 %v1390_v0  ;;  %v1397_v3 = vld [vmem:[%s2036_s1 + $0x70] sm:$0xff]  ;;  %v1388_v4 = vld [vmem:[%s2036_s1 + $0x28] sm:$0xff]  ;;  %s1915_s15 = scalar_lea.vmem [#allocation5], %s1259_s18  ;;  %s1404_s20 = sshll.u32 %s1621_s28, 8 }
  0x2b   : > { %620 = vmatpush.bf16.msra.mxu1 %v1398_v1  ;;  %v1396_v5 = vld [vmem:[%s2036_s1 + $0x68] sm:$0xff]  ;;  %v1387_v6 = vld [vmem:[%s2036_s1 + $0x20] sm:$0xff]  ;;  %v1386_v8 = vld [vmem:[%s2036_s1 + $0x18] sm:$0xff]  ;;  %s1173_s21 = scalar_lea.hbm %s2042_s7, %s1404_s20  ;;  %s1174_s23 = sshll.u32 %s1915_s15, 4  ;;  %s1175_s23 = int_to_ptr.vmem [resolvable:$true] %s1174_s23 }
  0x2c   : > { %v1395_v7 = vld [vmem:[%s2036_s1 + $0x60] sm:$0xff]  ;;  %v1394_v9 = vld [vmem:[%s2036_s1 + $0x58] sm:$0xff]  ;;  %v1385_v10 = vld [vmem:[%s2036_s1 + $0x10] sm:$0xff]  ;;  %s1176_s29 = sshll.u32 %s1173_s21, 4  ;;  %s1508_s18 = scalar_lea.hbm %s2042_s7, 512  ;;  %s1177_s29 = int_to_ptr.hbm [resolvable:$true] %s1176_s29 }
  0x2d   : > { %v1393_v11 = vld [vmem:[%s2036_s1 + $0x50] sm:$0xff]  ;;  %v1384_v12 = vld [vmem:[%s2036_s1 + $0x8] sm:$0xff]  ;;  %v1383_v14 = vld [vmem:[%s2036_s1] sm:$0xff]  ;;  %s1502_s8 = sshra.s32 %s1177_s29, 4  ;;  %s1503_s8 = int_to_ptr.hbm [resolvable:$true] %s1502_s8 }
  0x2e   : > { %532 = vmatpush.bf16.msra.mxu0 %v1389_v2  ;;  %v1392_v13 = vld [vmem:[%s2036_s1 + $0x48] sm:$0xff]  ;;  %v1391_v15 = vld [vmem:[%s2036_s1 + $0x40] sm:$0xff]  ;;  %v305_v17 = vld [vmem:[%s1690_s16 + $0x10] sm:$0xff]  ;;  %s1504_s28 = scalar_lea.hbm %s1503_s8, 256  ;;  %p1509_p0 = scmp.lt.s32.totalorder %s1503_s8, %s2042_s7 }
  0x2f   : > { %621 = vmatpush.bf16.msra.mxu1 %v1397_v3  ;;  %v303_v16 = vld [vmem:[%s1690_s16] sm:$0xff]  ;;  %v304_v18 = vld [vmem:[%s1690_s16 + $0x8] sm:$0xff]  ;;  %v306_v19 = vld [vmem:[%s1690_s16 + $0x18] sm:$0xff]  ;;  %p1505_p6 = scmp.ne.s32.totalorder %s1503_s8, %s1504_s28  ;;  %p1510_p1 = scmp.lt.s32.totalorder %s1508_s18, %s1504_s28 }
  0x30   : > { %v400_v20 = vpack.c.bf16 %v305_v17, %v303_v16  ;;  %v401_v21 = vpack.c.bf16 %v306_v19, %v304_v18  ;;  %v307_v22 = vld [vmem:[%s1690_s16 + $0x20] sm:$0xff]  ;;  %v309_v23 = vld [vmem:[%s1690_s16 + $0x30] sm:$0xff]  ;;  %v308_v24 = vld [vmem:[%s1690_s16 + $0x28] sm:$0xff] }
  0x31   : > { %v310_v25 = vld [vmem:[%s1690_s16 + $0x38] sm:$0xff]  ;;  %v402_v26 = vpack.c.bf16 %v309_v23, %v307_v22  ;;  %v311_v28 = vld [vmem:[%s1690_s16 + $0x40] sm:$0xff]  ;;  %v313_v29 = vld [vmem:[%s1690_s16 + $0x50] sm:$0xff]  ;;  %p1506_p9 = pnand %p1505_p6, %p1650_p11  ;;  %p1511_p3 = por %p1510_p1, %p1509_p0 }
  0x32   : > { %533 = vmatpush.bf16.msra.mxu0 %v1388_v4  ;;  %v403_v27 = vpack.c.bf16 %v310_v25, %v308_v24  ;;  %v312_v30 = vld [vmem:[%s1690_s16 + $0x48] sm:$0xff]  ;;  %v314_v31 = vld [vmem:[%s1690_s16 + $0x58] sm:$0xff]  ;;  %v404_v32 = vpack.c.bf16 %v313_v29, %v311_v28  ;;  %v315_v34 = vld [vmem:[%s1690_s16 + $0x60] sm:$0xff] }
  0x33   : > { %622 = vmatpush.bf16.msra.mxu1 %v1396_v5  ;;  %v405_v33 = vpack.c.bf16 %v314_v31, %v312_v30  ;;  %v317_v35 = vld [vmem:[%s1690_s16 + $0x70] sm:$0xff]  ;;  %v316_v36 = vld [vmem:[%s1690_s16 + $0x68] sm:$0xff]  ;;  %v318_v37 = vld [vmem:[%s1690_s16 + $0x78] sm:$0xff]  ;;  %p1507_p13 = pneg %p1506_p9 }
  0x34   : > { %v406_v38 = vpack.c.bf16 %v317_v35, %v315_v34  ;;  %v407_v39 = vpack.c.bf16 %v318_v37, %v316_v36  ;;  %v319_v40 = vld [vmem:[%s1690_s16 + $0x80] sm:$0xff]  ;;  %v321_v41 = vld [vmem:[%s1690_s16 + $0x90] sm:$0xff]  ;;  %v320_v42 = vld [vmem:[%s1690_s16 + $0x88] sm:$0xff] }
  0x35   : > { %v322_v43 = vld [vmem:[%s1690_s16 + $0x98] sm:$0xff]  ;;  %v408_v44 = vpack.c.bf16 %v321_v41, %v319_v40  ;;  %v323_v46 = vld [vmem:[%s1690_s16 + $0xa0] sm:$0xff]  ;;  %v325_v47 = vld [vmem:[%s1690_s16 + $0xb0] sm:$0xff]  ;;  %p1512_p4 = pnand %p1511_p3, %p1507_p13 }
  0x36   : > { %534 = vmatpush.bf16.msra.mxu0 %v1387_v6  ;;  %v409_v45 = vpack.c.bf16 %v322_v43, %v320_v42  ;;  %v324_v48 = vld [vmem:[%s1690_s16 + $0xa8] sm:$0xff]  ;;  %v326_v49 = vld [vmem:[%s1690_s16 + $0xb8] sm:$0xff]  ;;  %v410_v50 = vpack.c.bf16 %v325_v47, %v323_v46  ;;  %v327_v52 = vld [vmem:[%s1690_s16 + $0xc0] sm:$0xff] }
  0x37   : > { %623 = vmatpush.bf16.msra.mxu1 %v1395_v7  ;;  %v411_v51 = vpack.c.bf16 %v326_v49, %v324_v48  ;;  %v329_v53 = vld [vmem:[%s1690_s16 + $0xd0] sm:$0xff]  ;;  %v328_v54 = vld [vmem:[%s1690_s16 + $0xc8] sm:$0xff]  ;;  %v330_v55 = vld [vmem:[%s1690_s16 + $0xd8] sm:$0xff] }
  0x38   : > { %v412_v56 = vpack.c.bf16 %v329_v53, %v327_v52  ;;  %v413_v57 = vpack.c.bf16 %v330_v55, %v328_v54  ;;  %v1402_v58 = vld [vmem:[%s2038_s3 + $0x18] sm:$0xff]  ;;  %v1401_v59 = vld [vmem:[%s2038_s3 + $0x10] sm:$0xff]  ;;  %v1400_v60 = vld [vmem:[%s2038_s3 + $0x8] sm:$0xff] }
  0x39   : > { %846 = vmatpush.bf16.msra.mxu2 %v1402_v58  ;;  %v331_v61 = vld [vmem:[%s1690_s16 + $0xe0] sm:$0xff]  ;;  %v333_v62 = vld [vmem:[%s1690_s16 + $0xf0] sm:$0xff]  ;;  %v332_v63 = vld [vmem:[%s1690_s16 + $0xe8] sm:$0xff] }
  0x3a   : > { %535 = vmatpush.bf16.msra.mxu0 %v1386_v8  ;;  %v334_v0 = vld [vmem:[%s1690_s16 + $0xf8] sm:$0xff]  ;;  %v1399_v1 = vld [vmem:[%s2038_s3] sm:$0xff]  ;;  %v414_v2 = vpack.c.bf16 %v333_v62, %v331_v61  ;;  %v337_v5 = vld [vmem:[%s1690_s16 + $0x110] sm:$0xff] }
  0x3b   : > { %624 = vmatpush.bf16.msra.mxu1 %v1394_v9  ;;  %v415_v3 = vpack.c.bf16 %v334_v0, %v332_v63  ;;  %v335_v4 = vld [vmem:[%s1690_s16 + $0x100] sm:$0xff]  ;;  %v336_v6 = vld [vmem:[%s1690_s16 + $0x108] sm:$0xff]  ;;  %v338_v7 = vld [vmem:[%s1690_s16 + $0x118] sm:$0xff] }
  0x3c   : > { %v416_v8 = vpack.c.bf16 %v337_v5, %v335_v4  ;;  %v417_v9 = vpack.c.bf16 %v338_v7, %v336_v6  ;;  %v339_v19 = vld [vmem:[%s1690_s16 + $0x120] sm:$0xff]  ;;  %v342_v22 = vld [vmem:[%s1690_s16 + $0x138] sm:$0xff]  ;;  %v345_v37 = vld [vmem:[%s1690_s16 + $0x150] sm:$0xff] }
  0x3d   : > { %847 = vmatpush.bf16.msra.mxu2 %v1401_v59  ;;  %v343_v36 = vld [vmem:[%s1690_s16 + $0x140] sm:$0xff]  ;;  %v349_v54 = vld [vmem:[%s1690_s16 + $0x170] sm:$0xff]  ;;  %v348_v55 = vld [vmem:[%s1690_s16 + $0x168] sm:$0xff] }
  0x3e   : > { %536 = vmatpush.bf16.msra.mxu0 %v1385_v10  ;;  %v420_v43 = vpack.c.bf16 %v345_v37, %v343_v36  ;;  %v347_v53 = vld [vmem:[%s1690_s16 + $0x160] sm:$0xff]  ;;  %v353_v7 = vld [vmem:[%s1690_s16 + $0x190] sm:$0xff] }
  0x3f   : > { %625 = vmatpush.bf16.msra.mxu1 %v1393_v11  ;;  %v351_v6 = vld [vmem:[%s1690_s16 + $0x180] sm:$0xff] }
  0x41   : > { %848 = vmatpush.bf16.msra.mxu2 %v1400_v60  ;;  %v422_v60 = vpack.c.bf16 %v349_v54, %v347_v53 }
  0x42   : > { %537 = vmatpush.bf16.msra.mxu0 %v1384_v12  ;;  %v1795_v12 = vld [vmem:[%s2037_s2] ss:$0 sm:$0xff] }
  0x43   : > { %626 = vmatpush.bf16.msra.mxu1 %v1392_v13 }
  0x45   : > { %849 = vmatpush.bf16.msra.mxu2 %v1399_v1 }
  0x46   : > { %538 = vmatpush.bf16.msra.mxu0 %v1383_v14 }
  0x47   : > { %627 = vmatpush.bf16.msra.mxu1 %v1391_v15 }
  0x49   : > { %539 = vmatmul.bf16.vlgmr.msra.gmra.mxu0 %v400_v20  ;;  %v341_v20 = vld [vmem:[%s1690_s16 + $0x130] sm:$0xff] }
  0x4a   : > { %628 = vmatmul.bf16.vlgmr.msra.gmra.mxu1 %v401_v21  ;;  %v340_v21 = vld [vmem:[%s1690_s16 + $0x128] sm:$0xff] }
  0x59   : > { %544 = vmatmul.bf16.gmra.mxu0 %v402_v26  ;;  %v418_v26 = vpack.c.bf16 %v341_v20, %v339_v19 }
  0x5a   : > { %633 = vmatmul.bf16.gmra.mxu1 %v403_v27  ;;  %v419_v27 = vpack.c.bf16 %v342_v22, %v340_v21 }
  0x69   : > { %549 = vmatmul.bf16.gmra.mxu0 %v404_v32 }
  0x6a   : > { %638 = vmatmul.bf16.gmra.mxu1 %v405_v33 }
  0x79   : > { %554 = vmatmul.bf16.gmra.mxu0 %v406_v38  ;;  %v344_v38 = vld [vmem:[%s1690_s16 + $0x148] sm:$0xff] }
  0x7a   : > { %643 = vmatmul.bf16.gmra.mxu1 %v407_v39  ;;  %v346_v39 = vld [vmem:[%s1690_s16 + $0x158] sm:$0xff] }
  0x89   : > { %559 = vmatmul.bf16.gmra.mxu0 %v408_v44  ;;  %v421_v44 = vpack.c.bf16 %v346_v39, %v344_v38 }
  0x8a   : > { %648 = vmatmul.bf16.gmra.mxu1 %v409_v45 }
  0x99   : > { %564 = vmatmul.bf16.gmra.mxu0 %v410_v50 }
  0x9a   : > { %653 = vmatmul.bf16.gmra.mxu1 %v411_v51 }
  0xa9   : > { %569 = vmatmul.bf16.gmra.mxu0 %v412_v56  ;;  %v350_v56 = vld [vmem:[%s1690_s16 + $0x178] sm:$0xff] }
  0xaa   : > { %658 = vmatmul.bf16.gmra.mxu1 %v413_v57  ;;  %v423_v61 = vpack.c.bf16 %v350_v56, %v348_v55 }
  0xb9   : > { %574 = vmatmul.bf16.gmra.mxu0 %v414_v2 }
  0xba   : > { %663 = vmatmul.bf16.gmra.mxu1 %v415_v3 }
  0xc6   : > { %v540_v10 = vpop.f32.mrf.mxu0 }
  0xc7   : > { %v629_v11 = vpop.f32.mrf.mxu1  ;;  %v541_v13 = vadd.f32 %v1795_v12, %v540_v10 }
  0xc9   : > { %579 = vmatmul.bf16.gmra.mxu0 %v416_v8  ;;  %v630_v16 = vadd.f32 %v629_v11, %v541_v13  ;;  %v352_v8 = vld [vmem:[%s1690_s16 + $0x188] sm:$0xff] }
  0xca   : > { %668 = vmatmul.bf16.gmra.mxu1 %v417_v9  ;;  %v354_v9 = vld [vmem:[%s1690_s16 + $0x198] sm:$0xff] }
  0xcb   : > { %v709_v23 = vmax.f32 %v630_v16, 0.0 }
  0xce   : > { %v542_v14 = vpop.f32.mrf.mxu0 }
  0xcf   : > { %v631_v15 = vpop.f32.mrf.mxu1  ;;  %v543_v17 = vadd.f32 %v1795_v12, %v542_v14  ;;  %v424_v14 = vpack.c.bf16 %v353_v7, %v351_v6 }
  0xd1   : > { %v632_v18 = vadd.f32 %v631_v15, %v543_v17  ;;  %v425_v15 = vpack.c.bf16 %v354_v9, %v352_v8 }
  0xd3   : > { %v710_v24 = vmax.f32 %v632_v18, 0.0 }
  0xd5   : > { %v750_v25 = vpack.c.bf16 %v710_v24, %v709_v23  ;;  %v355_v24 = vld [vmem:[%s1690_s16 + $0x1a0] sm:$0xff] }
  0xd6   : > { %v545_v28 = vpop.f32.mrf.mxu0 }
  0xd7   : > { %v634_v29 = vpop.f32.mrf.mxu1  ;;  %1340 = vmatmul.msk.bf16.vlgmr.msra.gmra.mxu2 %vm793_vm0, %v750_v25  ;;  %v546_v30 = vadd.f32 %v1795_v12, %v545_v28  ;;  %v357_v25 = vld [vmem:[%s1690_s16 + $0x1b0] sm:$0xff] }
  0xd9   : > { %584 = vmatmul.bf16.gmra.mxu0 %v418_v26  ;;  %v635_v33 = vadd.f32 %v634_v29, %v546_v30  ;;  %v356_v26 = vld [vmem:[%s1690_s16 + $0x1a8] sm:$0xff] }
  0xda   : > { %673 = vmatmul.bf16.gmra.mxu1 %v419_v27  ;;  %v358_v27 = vld [vmem:[%s1690_s16 + $0x1b8] sm:$0xff] }
  0xdb   : > { %v711_v40 = vmax.f32 %v635_v33, 0.0 }
  0xde   : > { %v547_v31 = vpop.f32.mrf.mxu0 }
  0xdf   : > { %v636_v32 = vpop.f32.mrf.mxu1  ;;  %v548_v34 = vadd.f32 %v1795_v12, %v547_v31  ;;  %v426_v31 = vpack.c.bf16 %v357_v25, %v355_v24 }
  0xe1   : > { %v637_v35 = vadd.f32 %v636_v32, %v548_v34  ;;  %v427_v32 = vpack.c.bf16 %v358_v27, %v356_v26 }
  0xe3   : > { %v712_v41 = vmax.f32 %v637_v35, 0.0 }
  0xe5   : > { %v751_v42 = vpack.c.bf16 %v712_v41, %v711_v40  ;;  %v359_v41 = vld [vmem:[%s1690_s16 + $0x1c0] sm:$0xff] }
  0xe6   : > { %v550_v45 = vpop.f32.mrf.mxu0 }
  0xe7   : > { %v639_v46 = vpop.f32.mrf.mxu1  ;;  %1341 = vmatmul.msk.bf16.gmra.mxu2 %vm793_vm0, %v751_v42  ;;  %v551_v47 = vadd.f32 %v1795_v12, %v550_v45  ;;  %v361_v42 = vld [vmem:[%s1690_s16 + $0x1d0] sm:$0xff] }
  0xe9   : > { %589 = vmatmul.bf16.gmra.mxu0 %v420_v43  ;;  %v640_v50 = vadd.f32 %v639_v46, %v551_v47  ;;  %v360_v43 = vld [vmem:[%s1690_s16 + $0x1c8] sm:$0xff] }
  0xea   : > { %678 = vmatmul.bf16.gmra.mxu1 %v421_v44  ;;  %v362_v44 = vld [vmem:[%s1690_s16 + $0x1d8] sm:$0xff] }
  0xeb   : > { %v713_v57 = vmax.f32 %v640_v50, 0.0 }
  0xee   : > { %v552_v48 = vpop.f32.mrf.mxu0 }
  0xef   : > { %v641_v49 = vpop.f32.mrf.mxu1  ;;  %v553_v51 = vadd.f32 %v1795_v12, %v552_v48  ;;  %v428_v48 = vpack.c.bf16 %v361_v42, %v359_v41 }
  0xf1   : > { %v642_v52 = vadd.f32 %v641_v49, %v553_v51  ;;  %v429_v49 = vpack.c.bf16 %v362_v44, %v360_v43 }
  0xf3   : > { %v714_v58 = vmax.f32 %v642_v52, 0.0 }
  0xf5   : > { %v752_v59 = vpack.c.bf16 %v714_v58, %v713_v57  ;;  %v363_v58 = vld [vmem:[%s1690_s16 + $0x1e0] sm:$0xff] }
  0xf6   : > { %v555_v62 = vpop.f32.mrf.mxu0 }
  0xf7   : > { %v644_v63 = vpop.f32.mrf.mxu1  ;;  %1342 = vmatmul.msk.bf16.gmra.mxu2 %vm793_vm0, %v752_v59  ;;  %v556_v0 = vadd.f32 %v1795_v12, %v555_v62  ;;  %v365_v59 = vld [vmem:[%s1690_s16 + $0x1f0] sm:$0xff] }
  0xf9   : > { %594 = vmatmul.bf16.gmra.mxu0 %v422_v60  ;;  %v645_v3 = vadd.f32 %v644_v63, %v556_v0  ;;  %v364_v60 = vld [vmem:[%s1690_s16 + $0x1e8] sm:$0xff] }
  0xfa   : > { %683 = vmatmul.bf16.gmra.mxu1 %v423_v61  ;;  %v366_v61 = vld [vmem:[%s1690_s16 + $0x1f8] sm:$0xff]  ;;  %s1162_s16 = scalar_lea.sflag [#allocation4], %s1686_s22 }
  0xfb   : > { %v715_v10 = vmax.f32 %v645_v3, 0.0 }
  0xfe   : > { %v557_v1 = vpop.f32.mrf.mxu0 }
  0xff   : > { %v646_v2 = vpop.f32.mrf.mxu1  ;;  %v558_v4 = vadd.f32 %v1795_v12, %v557_v1  ;;  %v430_v1 = vpack.c.bf16 %v365_v59, %v363_v58 }
 0x101   : > { %v647_v5 = vadd.f32 %v646_v2, %v558_v4  ;;  %v431_v2 = vpack.c.bf16 %v366_v61, %v364_v60 }
 0x103   : > { %v716_v11 = vmax.f32 %v647_v5, 0.0 }
 0x105   : > { %v753_v13 = vpack.c.bf16 %v716_v11, %v715_v10 }
 0x106   : > { %v560_v16 = vpop.f32.mrf.mxu0 }
 0x107   : > { %v649_v17 = vpop.f32.mrf.mxu1  ;;  %1343 = vmatmul.msk.bf16.gmra.mxu2 %vm793_vm0, %v753_v13  ;;  %v561_v18 = vadd.f32 %v1795_v12, %v560_v16 }
 0x109   : > { %599 = vmatmul.bf16.gmra.mxu0 %v424_v14  ;;  %v650_v21 = vadd.f32 %v649_v17, %v561_v18  ;;  %v1403_v14 = vld [vmem:[%s2040_s5] sm:$0xff] }
 0x10a   : > { %688 = vmatmul.bf16.gmra.mxu1 %v425_v15  ;;  %1047 = vmatpush.bf16.msra.mxu3 %v1403_v14 }
 0x10b   : > { %v717_v28 = vmax.f32 %v650_v21, 0.0 }
 0x10e   : > { %v562_v19 = vpop.f32.mrf.mxu0 }
 0x10f   : > { %v651_v20 = vpop.f32.mrf.mxu1  ;;  %v563_v22 = vadd.f32 %v1795_v12, %v562_v19 }
 0x111   : > { %v652_v23 = vadd.f32 %v651_v20, %v563_v22 }
 0x113   : > { %v718_v29 = vmax.f32 %v652_v23, 0.0 }
 0x115   : > { %v754_v30 = vpack.c.bf16 %v718_v29, %v717_v28 }
 0x116   : > { %v565_v33 = vpop.f32.mrf.mxu0 }
 0x117   : > { %v654_v34 = vpop.f32.mrf.mxu1  ;;  %1344 = vmatmul.msk.bf16.gmra.mxu2 %vm793_vm0, %v754_v30  ;;  %v566_v35 = vadd.f32 %v1795_v12, %v565_v33 }
 0x119   : > { %604 = vmatmul.bf16.gmra.mxu0 %v426_v31  ;;  %v655_v38 = vadd.f32 %v654_v34, %v566_v35  ;;  %v1859_v31 = vld [vmem:[%s2039_s4] ss:$0 sm:$0xff] }
 0x11a   : > { %693 = vmatmul.bf16.gmra.mxu1 %v427_v32 }
 0x11b   : > { %v719_v45 = vmax.f32 %v655_v38, 0.0 }
 0x11e   : > { %v567_v36 = vpop.f32.mrf.mxu0 }
 0x11f   : > { %v656_v37 = vpop.f32.mrf.mxu1  ;;  %v568_v39 = vadd.f32 %v1795_v12, %v567_v36 }
 0x121   : > { %v657_v40 = vadd.f32 %v656_v37, %v568_v39 }
 0x123   : > { %v720_v46 = vmax.f32 %v657_v40, 0.0 }
 0x125   : > { %v755_v47 = vpack.c.bf16 %v720_v46, %v719_v45 }
 0x126   : > { %v570_v50 = vpop.f32.mrf.mxu0 }
 0x127   : > { %v659_v51 = vpop.f32.mrf.mxu1  ;;  %1345 = vmatmul.msk.bf16.gmra.mxu2 %vm793_vm0, %v755_v47  ;;  %v571_v52 = vadd.f32 %v1795_v12, %v570_v50 }
 0x129   : > { %609 = vmatmul.bf16.gmra.mxu0 %v428_v48  ;;  %v660_v55 = vadd.f32 %v659_v51, %v571_v52 }
 0x12a   : > { %698 = vmatmul.bf16.gmra.mxu1 %v429_v49 }
 0x12b   : > { %v721_v62 = vmax.f32 %v660_v55, 0.0 }
 0x12e   : > { %v572_v53 = vpop.f32.mrf.mxu0 }
 0x12f   : > { %v661_v54 = vpop.f32.mrf.mxu1  ;;  %v573_v56 = vadd.f32 %v1795_v12, %v572_v53 }
 0x131   : > { %v662_v57 = vadd.f32 %v661_v54, %v573_v56 }
 0x133   : > { %v722_v63 = vmax.f32 %v662_v57, 0.0 }
 0x135   : > { %v756_v0 = vpack.c.bf16 %v722_v63, %v721_v62 }
 0x136   : > { %v575_v3 = vpop.f32.mrf.mxu0 }
 0x137   : > { %v664_v4 = vpop.f32.mrf.mxu1  ;;  %1346 = vmatmul.msk.bf16.gmra.mxu2 %vm793_vm0, %v756_v0  ;;  %v576_v5 = vadd.f32 %v1795_v12, %v575_v3 }
 0x139   : > { %614 = vmatmul.bf16.gmra.mxu0 %v430_v1  ;;  %v665_v8 = vadd.f32 %v664_v4, %v576_v5 }
 0x13a   : > { %703 = vmatmul.bf16.gmra.mxu1 %v431_v2 }
 0x13b   : > { %v723_v11 = vmax.f32 %v665_v8, 0.0 }
 0x13e   : > { %v577_v6 = vpop.f32.mrf.mxu0 }
 0x13f   : > { %v666_v7 = vpop.f32.mrf.mxu1  ;;  %v578_v9 = vadd.f32 %v1795_v12, %v577_v6 }
 0x141   : > { %v667_v10 = vadd.f32 %v666_v7, %v578_v9 }
 0x143   : > { %v724_v13 = vmax.f32 %v667_v10, 0.0 }
 0x145   : > { %v757_v15 = vpack.c.bf16 %v724_v13, %v723_v11 }
 0x146   : > { %v580_v16 = vpop.f32.mrf.mxu0 }
 0x147   : > { %v669_v17 = vpop.f32.mrf.mxu1  ;;  %1347 = vmatmul.msk.bf16.gmra.mxu2 %vm793_vm0, %v757_v15  ;;  %v581_v18 = vadd.f32 %v1795_v12, %v580_v16 }
 0x149   : > { %v670_v21 = vadd.f32 %v669_v17, %v581_v18 }
 0x14b   : > { %v725_v24 = vmax.f32 %v670_v21, 0.0 }
 0x14e   : > { %v582_v19 = vpop.f32.mrf.mxu0 }
 0x14f   : > { %v671_v20 = vpop.f32.mrf.mxu1  ;;  %v583_v22 = vadd.f32 %v1795_v12, %v582_v19 }
 0x151   : > { %v672_v23 = vadd.f32 %v671_v20, %v583_v22 }
 0x153   : > { %v726_v25 = vmax.f32 %v672_v23, 0.0 }
 0x155   : > { %v758_v26 = vpack.c.bf16 %v726_v25, %v725_v24 }
 0x156   : > { %v585_v27 = vpop.f32.mrf.mxu0 }
 0x157   : > { %v674_v28 = vpop.f32.mrf.mxu1  ;;  %1348 = vmatmul.msk.bf16.gmra.mxu2 %vm793_vm0, %v758_v26  ;;  %v586_v30 = vadd.f32 %v1795_v12, %v585_v27 }
 0x159   : > { %v675_v34 = vadd.f32 %v674_v28, %v586_v30 }
 0x15a   : > { %v851_v29 = vpop.f32.mrf.mxu2 }
 0x15b   : > { %v852_v36 = vadd.f32 %v1859_v31, %v851_v29  ;;  %v727_v39 = vmax.f32 %v675_v34, 0.0 }
 0x15d   : > { %v931_v42 = vmax.f32 %v852_v36, 0.0 }
 0x15e   : > { %v587_v32 = vpop.f32.mrf.mxu0 }
 0x15f   : > { %v676_v33 = vpop.f32.mrf.mxu1  ;;  %v588_v35 = vadd.f32 %v1795_v12, %v587_v32 }
 0x161   : > { %v677_v37 = vadd.f32 %v676_v33, %v588_v35 }
 0x162   : > { %v853_v38 = vpop.f32.mrf.mxu2 }
 0x163   : > { %v728_v40 = vmax.f32 %v677_v37, 0.0  ;;  %v854_v41 = vadd.f32 %v1859_v31, %v853_v38 }
 0x165   : > { %v759_v43 = vpack.c.bf16 %v728_v40, %v727_v39  ;;  %v932_v44 = vmax.f32 %v854_v41, 0.0 }
 0x166   : > { %v590_v45 = vpop.f32.mrf.mxu0 }
 0x167   : > { %v679_v46 = vpop.f32.mrf.mxu1  ;;  %1349 = vmatmul.msk.bf16.gmra.mxu2 %vm793_vm0, %v759_v43  ;;  %v966_v47 = vpack.c.bf16 %v932_v44, %v931_v42  ;;  %v591_v49 = vadd.f32 %v1795_v12, %v590_v45 }
 0x169   : > { %1360 = vmatmul.msk.bf16.vlgmr.msra.gmra.mxu3 %vm991_vm1, %v966_v47  ;;  %v680_v52 = vadd.f32 %v679_v46, %v591_v49 }
 0x16a   : > { %v856_v48 = vpop.f32.mrf.mxu2 }
 0x16b   : > { %v857_v54 = vadd.f32 %v1859_v31, %v856_v48  ;;  %v729_v57 = vmax.f32 %v680_v52, 0.0 }
 0x16d   : > { %v933_v60 = vmax.f32 %v857_v54, 0.0 }
 0x16e   : > { %v592_v50 = vpop.f32.mrf.mxu0 }
 0x16f   : > { %v681_v51 = vpop.f32.mrf.mxu1  ;;  %v593_v53 = vadd.f32 %v1795_v12, %v592_v50 }
 0x171   : > { %v682_v55 = vadd.f32 %v681_v51, %v593_v53 }
 0x172   : > { %v858_v56 = vpop.f32.mrf.mxu2 }
 0x173   : > { %v730_v58 = vmax.f32 %v682_v55, 0.0  ;;  %v859_v59 = vadd.f32 %v1859_v31, %v858_v56 }
 0x175   : > { %v760_v61 = vpack.c.bf16 %v730_v58, %v729_v57  ;;  %v934_v62 = vmax.f32 %v859_v59, 0.0 }
 0x176   : > { %v595_v63 = vpop.f32.mrf.mxu0 }
 0x177   : > { %v684_v0 = vpop.f32.mrf.mxu1  ;;  %1350 = vmatmul.msk.bf16.gmra.mxu2 %vm793_vm0, %v760_v61  ;;  %v967_v1 = vpack.c.bf16 %v934_v62, %v933_v60  ;;  %v596_v3 = vadd.f32 %v1795_v12, %v595_v63 }
 0x179   : > { %1361 = vmatmul.msk.bf16.gmra.mxu3 %vm991_vm1, %v967_v1  ;;  %v685_v6 = vadd.f32 %v684_v0, %v596_v3 }
 0x17a   : > { %v861_v2 = vpop.f32.mrf.mxu2 }
 0x17b   : > { %v862_v8 = vadd.f32 %v1859_v31, %v861_v2  ;;  %v731_v11 = vmax.f32 %v685_v6, 0.0 }
 0x17d   : > { %v935_v15 = vmax.f32 %v862_v8, 0.0 }
 0x17e   : > { %v597_v4 = vpop.f32.mrf.mxu0 }
 0x17f   : > { %v686_v5 = vpop.f32.mrf.mxu1  ;;  %v598_v7 = vadd.f32 %v1795_v12, %v597_v4 }
 0x181   : > { %v687_v9 = vadd.f32 %v686_v5, %v598_v7 }
 0x182   : > { %v863_v10 = vpop.f32.mrf.mxu2 }
 0x183   : > { %v732_v13 = vmax.f32 %v687_v9, 0.0  ;;  %v864_v14 = vadd.f32 %v1859_v31, %v863_v10 }
 0x185   : > { %v761_v16 = vpack.c.bf16 %v732_v13, %v731_v11  ;;  %v936_v17 = vmax.f32 %v864_v14, 0.0 }
 0x186   : > { %v600_v18 = vpop.f32.mrf.mxu0 }
 0x187   : > { %v689_v19 = vpop.f32.mrf.mxu1  ;;  %1351 = vmatmul.msk.bf16.gmra.mxu2 %vm793_vm0, %v761_v16  ;;  %v968_v20 = vpack.c.bf16 %v936_v17, %v935_v15  ;;  %v601_v22 = vadd.f32 %v1795_v12, %v600_v18 }
 0x189   : > { %1362 = vmatmul.msk.bf16.gmra.mxu3 %vm991_vm1, %v968_v20  ;;  %v690_v25 = vadd.f32 %v689_v19, %v601_v22 }
 0x18a   : > { %v866_v21 = vpop.f32.mrf.mxu2 }
 0x18b   : > { %v867_v27 = vadd.f32 %v1859_v31, %v866_v21  ;;  %v733_v30 = vmax.f32 %v690_v25, 0.0 }
 0x18d   : > { %v937_v34 = vmax.f32 %v867_v27, 0.0 }
 0x18e   : > { %v602_v23 = vpop.f32.mrf.mxu0 }
 0x18f   : > { %v691_v24 = vpop.f32.mrf.mxu1  ;;  %v603_v26 = vadd.f32 %v1795_v12, %v602_v23 }
 0x191   : > { %v692_v28 = vadd.f32 %v691_v24, %v603_v26 }
 0x192   : > { %v868_v29 = vpop.f32.mrf.mxu2 }
 0x193   : > { %v734_v32 = vmax.f32 %v692_v28, 0.0  ;;  %v869_v33 = vadd.f32 %v1859_v31, %v868_v29 }
 0x195   : > { %v762_v35 = vpack.c.bf16 %v734_v32, %v733_v30  ;;  %v938_v36 = vmax.f32 %v869_v33, 0.0 }
 0x196   : > { %v605_v37 = vpop.f32.mrf.mxu0 }
 0x197   : > { %v694_v38 = vpop.f32.mrf.mxu1  ;;  %1352 = vmatmul.msk.bf16.gmra.mxu2 %vm793_vm0, %v762_v35  ;;  %v969_v39 = vpack.c.bf16 %v938_v36, %v937_v34  ;;  %v606_v41 = vadd.f32 %v1795_v12, %v605_v37 }
 0x199   : > { %1363 = vmatmul.msk.bf16.gmra.mxu3 %vm991_vm1, %v969_v39  ;;  %v695_v44 = vadd.f32 %v694_v38, %v606_v41 }
 0x19a   : > { %v871_v40 = vpop.f32.mrf.mxu2 }
 0x19b   : > { %v872_v46 = vadd.f32 %v1859_v31, %v871_v40  ;;  %v735_v49 = vmax.f32 %v695_v44, 0.0 }
 0x19d   : > { %v939_v52 = vmax.f32 %v872_v46, 0.0 }
 0x19e   : > { %v607_v42 = vpop.f32.mrf.mxu0 }
 0x19f   : > { %v696_v43 = vpop.f32.mrf.mxu1  ;;  %v608_v45 = vadd.f32 %v1795_v12, %v607_v42 }
 0x1a1   : > { %v697_v47 = vadd.f32 %v696_v43, %v608_v45  ;;  %v1912_v43 = vld [vmem:[%s2041_s6] ss:$0 sm:$0xff] }
 0x1a2   : > { %v873_v48 = vpop.f32.mrf.mxu2 }
 0x1a3   : > { %v736_v50 = vmax.f32 %v697_v47, 0.0  ;;  %v874_v51 = vadd.f32 %v1859_v31, %v873_v48 }
 0x1a5   : > { %v763_v53 = vpack.c.bf16 %v736_v50, %v735_v49  ;;  %v940_v54 = vmax.f32 %v874_v51, 0.0 }
 0x1a6   : > { %v610_v55 = vpop.f32.mrf.mxu0 }
 0x1a7   : > { %v699_v56 = vpop.f32.mrf.mxu1  ;;  %v970_v57 = vpack.c.bf16 %v940_v54, %v939_v52  ;;  %1353 = vmatmul.msk.bf16.gmra.mxu2 %vm793_vm0, %v763_v53  ;;  %v611_v59 = vadd.f32 %v1795_v12, %v610_v55 }
 0x1a9   : > { %1364 = vmatmul.msk.bf16.gmra.mxu3 %vm991_vm1, %v970_v57  ;;  %v700_v62 = vadd.f32 %v699_v56, %v611_v59 }
 0x1aa   : > { %v876_v58 = vpop.f32.mrf.mxu2 }
 0x1ab   : > { %v877_v0 = vadd.f32 %v1859_v31, %v876_v58  ;;  %v737_v3 = vmax.f32 %v700_v62, 0.0 }
 0x1ad   : > { %v941_v6 = vmax.f32 %v877_v0, 0.0 }
 0x1ae   : > { %v612_v60 = vpop.f32.mrf.mxu0 }
 0x1af   : > { %v701_v61 = vpop.f32.mrf.mxu1  ;;  %v613_v63 = vadd.f32 %v1795_v12, %v612_v60 }
 0x1b1   : > { %v702_v1 = vadd.f32 %v701_v61, %v613_v63 }
 0x1b2   : > { %v878_v2 = vpop.f32.mrf.mxu2 }
 0x1b3   : > { %v738_v4 = vmax.f32 %v702_v1, 0.0  ;;  %v879_v5 = vadd.f32 %v1859_v31, %v878_v2 }
 0x1b5   : > { %v764_v7 = vpack.c.bf16 %v738_v4, %v737_v3  ;;  %v942_v8 = vmax.f32 %v879_v5, 0.0 }
 0x1b6   : > { %v615_v9 = vpop.f32.mrf.mxu0 }
 0x1b7   : > { %v704_v10 = vpop.f32.mrf.mxu1  ;;  %v971_v11 = vpack.c.bf16 %v942_v8, %v941_v6  ;;  %1354 = vmatmul.msk.bf16.gmra.mxu2 %vm793_vm0, %v764_v7  ;;  %v616_v14 = vadd.f32 %v1795_v12, %v615_v9 }
 0x1b9   : > { %1365 = vmatmul.msk.bf16.gmra.mxu3 %vm991_vm1, %v971_v11  ;;  %v705_v16 = vadd.f32 %v704_v10, %v616_v14 }
 0x1ba   : > { %v881_v13 = vpop.f32.mrf.mxu2 }
 0x1bb   : > { %v882_v19 = vadd.f32 %v1859_v31, %v881_v13  ;;  %v739_v22 = vmax.f32 %v705_v16, 0.0 }
 0x1bd   : > { %v943_v25 = vmax.f32 %v882_v19, 0.0 }
 0x1be   : > { %v617_v15 = vpop.f32.mrf.mxu0 }
 0x1bf   : > { %v618_v17 = vadd.f32 %v1795_v12, %v617_v15  ;;  %v706_v18 = vpop.f32.mrf.mxu1 }
 0x1c1   : > { %v707_v20 = vadd.f32 %v706_v18, %v618_v17 }
 0x1c2   : > { %v883_v21 = vpop.f32.mrf.mxu2 }
 0x1c3   : > { %v740_v23 = vmax.f32 %v707_v20, 0.0  ;;  %v884_v24 = vadd.f32 %v1859_v31, %v883_v21 }
 0x1c5   : > { %v765_v26 = vpack.c.bf16 %v740_v23, %v739_v22  ;;  %v944_v27 = vmax.f32 %v884_v24, 0.0 }
 0x1c7   : > { %v972_v28 = vpack.c.bf16 %v944_v27, %v943_v25  ;;  %1355 = vmatmul.msk.bf16.gmra.mxu2 %vm793_vm0, %v765_v26 }
 0x1c9   : > { %1366 = vmatmul.msk.bf16.gmra.mxu3 %vm991_vm1, %v972_v28 }
 0x1ca   : > { %v886_v29 = vpop.f32.mrf.mxu2 }
 0x1cb   : > { %v887_v12 = vadd.f32 %v1859_v31, %v886_v29 }
 0x1cd   : > { %v945_v33 = vmax.f32 %v887_v12, 0.0 }
 0x1d2   : > { %v888_v30 = vpop.f32.mrf.mxu2 }
 0x1d3   : > { %v889_v32 = vadd.f32 %v1859_v31, %v888_v30 }
 0x1d5   : > { %v946_v34 = vmax.f32 %v889_v32, 0.0 }
 0x1d7   : > { %v973_v35 = vpack.c.bf16 %v946_v34, %v945_v33 }
 0x1d9   : > { %1367 = vmatmul.msk.bf16.gmra.mxu3 %vm991_vm1, %v973_v35 }
 0x1da   : > { %v891_v36 = vpop.f32.mrf.mxu2 }
 0x1db   : > { %v892_v37 = vadd.f32 %v1859_v31, %v891_v36 }
 0x1dd   : > { %v947_v40 = vmax.f32 %v892_v37, 0.0 }
 0x1e2   : > { %v893_v38 = vpop.f32.mrf.mxu2 }
 0x1e3   : > { %v894_v39 = vadd.f32 %v1859_v31, %v893_v38 }
 0x1e5   : > { %v948_v41 = vmax.f32 %v894_v39, 0.0 }
 0x1e7   : > { %v974_v42 = vpack.c.bf16 %v948_v41, %v947_v40 }
 0x1e9   : > { %1368 = vmatmul.msk.bf16.gmra.mxu3 %vm991_vm1, %v974_v42 }
 0x1ea   : > { %v896_v44 = vpop.f32.mrf.mxu2 }
 0x1eb   : > { %v897_v47 = vadd.f32 %v1859_v31, %v896_v44 }
 0x1ec   : > { %v1049_v45 = vpop.f32.mrf.mxu3 }
 0x1ed   : > { %v1050_v46 = vadd.f32 %v1912_v43, %v1049_v45  ;;  %v949_v51 = vmax.f32 %v897_v47, 0.0 }
 0x1ef   : > { %1129 = vst [vmem:[%s1915_s15] sm:$0xff] %v1050_v46 }
 0x1f2   : > { %v898_v48 = vpop.f32.mrf.mxu2 }
 0x1f3   : > { %v899_v49 = vadd.f32 %v1859_v31, %v898_v48 }
 0x1f4   : > { %v1051_v50 = vpop.f32.mrf.mxu3 }
 0x1f5   : > { %v950_v52 = vmax.f32 %v899_v49, 0.0  ;;  %v1052_v53 = vadd.f32 %v1912_v43, %v1051_v50 }
 0x1f7   : > { %v975_v54 = vpack.c.bf16 %v950_v52, %v949_v51  ;;  %1130 = vst [vmem:[%s1915_s15 + $0x8] sm:$0xff] %v1052_v53 }
 0x1f9   : > { %1369 = vmatmul.msk.bf16.gmra.mxu3 %vm991_vm1, %v975_v54 }
 0x1fa   : > { %v901_v55 = vpop.f32.mrf.mxu2 }
 0x1fb   : > { %v902_v58 = vadd.f32 %v1859_v31, %v901_v55 }
 0x1fc   : > { %v1054_v56 = vpop.f32.mrf.mxu3 }
 0x1fd   : > { %v1055_v57 = vadd.f32 %v1912_v43, %v1054_v56  ;;  %v951_v62 = vmax.f32 %v902_v58, 0.0 }
 0x1ff   : > { %1131 = vst [vmem:[%s1915_s15 + $0x10] sm:$0xff] %v1055_v57 }
 0x202   : > { %v903_v59 = vpop.f32.mrf.mxu2 }
 0x203   : > { %v904_v60 = vadd.f32 %v1859_v31, %v903_v59 }
 0x204   : > { %v1056_v61 = vpop.f32.mrf.mxu3 }
 0x205   : > { %v952_v63 = vmax.f32 %v904_v60, 0.0  ;;  %v1057_v0 = vadd.f32 %v1912_v43, %v1056_v61 }
 0x207   : > { %v976_v1 = vpack.c.bf16 %v952_v63, %v951_v62  ;;  %1132 = vst [vmem:[%s1915_s15 + $0x18] sm:$0xff] %v1057_v0 }
 0x209   : > { %1370 = vmatmul.msk.bf16.gmra.mxu3 %vm991_vm1, %v976_v1 }
 0x20a   : > { %v906_v2 = vpop.f32.mrf.mxu2 }
 0x20b   : > { %v907_v5 = vadd.f32 %v1859_v31, %v906_v2 }
 0x20c   : > { %v1059_v3 = vpop.f32.mrf.mxu3 }
 0x20d   : > { %v1060_v4 = vadd.f32 %v1912_v43, %v1059_v3  ;;  %v953_v9 = vmax.f32 %v907_v5, 0.0 }
 0x20f   : > { %1133 = vst [vmem:[%s1915_s15 + $0x20] sm:$0xff] %v1060_v4 }
 0x212   : > { %v908_v6 = vpop.f32.mrf.mxu2 }
 0x213   : > { %v909_v7 = vadd.f32 %v1859_v31, %v908_v6 }
 0x214   : > { %v1061_v8 = vpop.f32.mrf.mxu3 }
 0x215   : > { %v954_v10 = vmax.f32 %v909_v7, 0.0  ;;  %v1062_v11 = vadd.f32 %v1912_v43, %v1061_v8 }
 0x217   : > { %v977_v13 = vpack.c.bf16 %v954_v10, %v953_v9  ;;  %1134 = vst [vmem:[%s1915_s15 + $0x28] sm:$0xff] %v1062_v11 }
 0x219   : > { %1371 = vmatmul.msk.bf16.gmra.mxu3 %vm991_vm1, %v977_v13 }
 0x21a   : > { %v911_v14 = vpop.f32.mrf.mxu2 }
 0x21b   : > { %v912_v17 = vadd.f32 %v1859_v31, %v911_v14 }
 0x21c   : > { %v1064_v15 = vpop.f32.mrf.mxu3 }
 0x21d   : > { %v1065_v16 = vadd.f32 %v1912_v43, %v1064_v15  ;;  %v955_v21 = vmax.f32 %v912_v17, 0.0 }
 0x21f   : > { %1135 = vst [vmem:[%s1915_s15 + $0x30] sm:$0xff] %v1065_v16 }
 0x222   : > { %v913_v18 = vpop.f32.mrf.mxu2 }
 0x223   : > { %v914_v19 = vadd.f32 %v1859_v31, %v913_v18 }
 0x224   : > { %v1066_v20 = vpop.f32.mrf.mxu3 }
 0x225   : > { %v956_v22 = vmax.f32 %v914_v19, 0.0  ;;  %v1067_v23 = vadd.f32 %v1912_v43, %v1066_v20 }
 0x227   : > { %v978_v24 = vpack.c.bf16 %v956_v22, %v955_v21  ;;  %1136 = vst [vmem:[%s1915_s15 + $0x38] sm:$0xff] %v1067_v23 }
 0x229   : > { %1372 = vmatmul.msk.bf16.gmra.mxu3 %vm991_vm1, %v978_v24 }
 0x22a   : > { %v916_v25 = vpop.f32.mrf.mxu2 }
 0x22b   : > { %v917_v28 = vadd.f32 %v1859_v31, %v916_v25 }
 0x22c   : > { %v1069_v26 = vpop.f32.mrf.mxu3 }
 0x22d   : > { %v1070_v27 = vadd.f32 %v1912_v43, %v1069_v26  ;;  %v957_v32 = vmax.f32 %v917_v28, 0.0 }
 0x22f   : > { %1137 = vst [vmem:[%s1915_s15 + $0x40] sm:$0xff] %v1070_v27 }
 0x232   : > { %v918_v29 = vpop.f32.mrf.mxu2 }
 0x233   : > { %v919_v12 = vadd.f32 %v1859_v31, %v918_v29 }
 0x234   : > { %v1071_v30 = vpop.f32.mrf.mxu3 }
 0x235   : > { %v958_v33 = vmax.f32 %v919_v12, 0.0  ;;  %v1072_v34 = vadd.f32 %v1912_v43, %v1071_v30 }
 0x237   : > { %v979_v35 = vpack.c.bf16 %v958_v33, %v957_v32  ;;  %1138 = vst [vmem:[%s1915_s15 + $0x48] sm:$0xff] %v1072_v34 }
 0x239   : > { %1373 = vmatmul.msk.bf16.gmra.mxu3 %vm991_vm1, %v979_v35 }
 0x23a   : > { %v921_v36 = vpop.f32.mrf.mxu2 }
 0x23b   : > { %v922_v39 = vadd.f32 %v1859_v31, %v921_v36 }
 0x23c   : > { %v1074_v37 = vpop.f32.mrf.mxu3 }
 0x23d   : > { %v1075_v38 = vadd.f32 %v1912_v43, %v1074_v37  ;;  %v959_v44 = vmax.f32 %v922_v39, 0.0 }
 0x23f   : > { %1139 = vst [vmem:[%s1915_s15 + $0x50] sm:$0xff] %v1075_v38 }
 0x242   : > { %v923_v40 = vpop.f32.mrf.mxu2 }
 0x243   : > { %v924_v41 = vadd.f32 %v1859_v31, %v923_v40 }
 0x244   : > { %v1076_v42 = vpop.f32.mrf.mxu3 }
 0x245   : > { %v960_v45 = vmax.f32 %v924_v41, 0.0  ;;  %v1077_v46 = vadd.f32 %v1912_v43, %v1076_v42 }
 0x247   : > { %v980_v47 = vpack.c.bf16 %v960_v45, %v959_v44  ;;  %1140 = vst [vmem:[%s1915_s15 + $0x58] sm:$0xff] %v1077_v46 }
 0x249   : > { %1374 = vmatmul.msk.bf16.gmra.mxu3 %vm991_vm1, %v980_v47 }
 0x24a   : > { %v926_v48 = vpop.f32.mrf.mxu2 }
 0x24b   : > { %v927_v51 = vadd.f32 %v1859_v31, %v926_v48 }
 0x24c   : > { %v1079_v49 = vpop.f32.mrf.mxu3 }
 0x24d   : > { %v1080_v50 = vadd.f32 %v1912_v43, %v1079_v49  ;;  %v961_v55 = vmax.f32 %v927_v51, 0.0 }
 0x24f   : > { %1141 = vst [vmem:[%s1915_s15 + $0x60] sm:$0xff] %v1080_v50 }
 0x252   : > { %v928_v52 = vpop.f32.mrf.mxu2 }
 0x253   : > { %v929_v53 = vadd.f32 %v1859_v31, %v928_v52 }
 0x254   : > { %v1081_v54 = vpop.f32.mrf.mxu3 }
 0x255   : > { %v962_v56 = vmax.f32 %v929_v53, 0.0  ;;  %v1082_v57 = vadd.f32 %v1912_v43, %v1081_v54 }
 0x257   : > { %v981_v58 = vpack.c.bf16 %v962_v56, %v961_v55  ;;  %1142 = vst [vmem:[%s1915_s15 + $0x68] sm:$0xff] %v1082_v57 }
 0x259   : > { %1375 = vmatmul.msk.bf16.gmra.mxu3 %vm991_vm1, %v981_v58 }
 0x25c   : > { %v1084_v59 = vpop.f32.mrf.mxu3 }
 0x25d   : > { %v1085_v60 = vadd.f32 %v1912_v43, %v1084_v59 }
 0x25f   : > { %1143 = vst [vmem:[%s1915_s15 + $0x70] sm:$0xff] %v1085_v60 }
 0x264   : > { %v1086_v61 = vpop.f32.mrf.mxu3 }
 0x265   : > { %v1087_v31 = vadd.f32 %v1912_v43, %v1086_v61 }
 0x267   : > { %1144 = vst [vmem:[%s1915_s15 + $0x78] sm:$0xff] %v1087_v31 }
 0x26c   : > { %v1089_v62 = vpop.f32.mrf.mxu3 }
 0x26d   : > { %v1090_v63 = vadd.f32 %v1912_v43, %v1089_v62 }
 0x26f   : > { %1145 = vst [vmem:[%s1915_s15 + $0x80] sm:$0xff] %v1090_v63 }
 0x274   : > { %v1091_v0 = vpop.f32.mrf.mxu3 }
 0x275   : > { %v1092_v1 = vadd.f32 %v1912_v43, %v1091_v0 }
 0x277   : > { %1146 = vst [vmem:[%s1915_s15 + $0x88] sm:$0xff] %v1092_v1 }
 0x27c   : > { %v1094_v2 = vpop.f32.mrf.mxu3 }
 0x27d   : > { %v1095_v3 = vadd.f32 %v1912_v43, %v1094_v2 }
 0x27f   : > { %1147 = vst [vmem:[%s1915_s15 + $0x90] sm:$0xff] %v1095_v3 }
 0x284   : > { %v1096_v4 = vpop.f32.mrf.mxu3 }
 0x285   : > { %v1097_v5 = vadd.f32 %v1912_v43, %v1096_v4 }
 0x287   : > { %1148 = vst [vmem:[%s1915_s15 + $0x98] sm:$0xff] %v1097_v5 }
 0x28c   : > { %v1099_v6 = vpop.f32.mrf.mxu3 }
 0x28d   : > { %v1100_v7 = vadd.f32 %v1912_v43, %v1099_v6 }
 0x28f   : > { %1149 = vst [vmem:[%s1915_s15 + $0xa0] sm:$0xff] %v1100_v7 }
 0x294   : > { %v1101_v8 = vpop.f32.mrf.mxu3 }
 0x295   : > { %v1102_v9 = vadd.f32 %v1912_v43, %v1101_v8 }
 0x297   : > { %1150 = vst [vmem:[%s1915_s15 + $0xa8] sm:$0xff] %v1102_v9 }
 0x29c   : > { %v1104_v10 = vpop.f32.mrf.mxu3 }
 0x29d   : > { %v1105_v11 = vadd.f32 %v1912_v43, %v1104_v10 }
 0x29f   : > { %1151 = vst [vmem:[%s1915_s15 + $0xb0] sm:$0xff] %v1105_v11 }
 0x2a4   : > { %v1106_v13 = vpop.f32.mrf.mxu3 }
 0x2a5   : > { %v1107_v14 = vadd.f32 %v1912_v43, %v1106_v13 }
 0x2a7   : > { %1152 = vst [vmem:[%s1915_s15 + $0xb8] sm:$0xff] %v1107_v14 }
 0x2ac   : > { %v1109_v15 = vpop.f32.mrf.mxu3 }
 0x2ad   : > { %v1110_v16 = vadd.f32 %v1912_v43, %v1109_v15 }
 0x2af   : > { %1153 = vst [vmem:[%s1915_s15 + $0xc0] sm:$0xff] %v1110_v16 }
 0x2b4   : > { %v1111_v17 = vpop.f32.mrf.mxu3 }
 0x2b5   : > { %v1112_v18 = vadd.f32 %v1912_v43, %v1111_v17 }
 0x2b7   : > { %1154 = vst [vmem:[%s1915_s15 + $0xc8] sm:$0xff] %v1112_v18 }
 0x2bc   : > { %v1114_v19 = vpop.f32.mrf.mxu3 }
 0x2bd   : > { %v1115_v20 = vadd.f32 %v1912_v43, %v1114_v19 }
 0x2bf   : > { %1155 = vst [vmem:[%s1915_s15 + $0xd0] sm:$0xff] %v1115_v20 }
 0x2c4   : > { %v1116_v21 = vpop.f32.mrf.mxu3 }
 0x2c5   : > { %v1117_v22 = vadd.f32 %v1912_v43, %v1116_v21 }
 0x2c7   : > { %1156 = vst [vmem:[%s1915_s15 + $0xd8] sm:$0xff] %v1117_v22 }
 0x2cc   : > { %v1119_v23 = vpop.f32.mrf.mxu3 }
 0x2cd   : > { %v1120_v24 = vadd.f32 %v1912_v43, %v1119_v23 }
 0x2cf   : > { %1157 = vst [vmem:[%s1915_s15 + $0xe0] sm:$0xff] %v1120_v24 }
 0x2d4   : > { %v1121_v25 = vpop.f32.mrf.mxu3 }
 0x2d5   : > { %v1122_v26 = vadd.f32 %v1912_v43, %v1121_v25 }
 0x2d7   : > { %1158 = vst [vmem:[%s1915_s15 + $0xe8] sm:$0xff] %v1122_v26 }
 0x2dc   : > { %v1124_v27 = vpop.f32.mrf.mxu3 }
 0x2dd   : > { %v1125_v28 = vadd.f32 %v1912_v43, %v1124_v27 }
 0x2df   : > { %1159 = vst [vmem:[%s1915_s15 + $0xf0] sm:$0xff] %v1125_v28 }
 0x2e4   : > { %v1126_v29 = vpop.f32.mrf.mxu3 }
 0x2e5   : > { %v1127_v12 = vadd.f32 %v1912_v43, %v1126_v29 }
 0x2e7   : > { %1160 = vst [vmem:[%s1915_s15 + $0xf8] sm:$0xff] %v1127_v12 }
 0x2e8   : > { %1515 = shalt.err (!%p1512_p4)
}
 0x2e9   : > { %s1558_s22 = smov 128   ;;  %s1559_s15 = smov 8  }
 0x2ea   : > { %1407 = dma.vmem_to_hbm [thread:$0]  (%p1650_p11), %s1175_s23, 4096, %s1177_s29, %s1162_s16, %s1558_s22, %s1558_s22, %s1559_s15  }
 0x2eb PF: > { %s1191_s20 = sand.u32 1, %s1542_s24   ;;  %p2049_p7 = scmp.ge.s32.totalorder %s1554_s27, 2 }
 0x2ec   : > { %s1192_s10 = scalar_lea.sflag [#allocation4], %s1191_s20 }
 0x2ed   : > { %p1414_p5 = pnand %p2049_p7, %p1654_p12 }
 0x2ef   : > { %p1415_p8 = pneg %p1414_p5 }
 0x2f1   : > { %1537 = dma.done.wait (%p1415_p8), %s1192_s10, 4096  }
 0x2f2   : > { %1539 = vsyncadd (%p1415_p8), %s1192_s10, 4294963200  ;;  %s2050_s9 = sld [smem:[#allocation8_spill]]  ;;  %p20_p10 = scmp.ge.s32.totalorder %s1625_s30, 4  }
 0x2f3   : > { %s2051_s24 = smov %s1546_s25  ;;  %s2052_s25 = smov %s1550_s26 }
 0x2f4   : > { %s2054_s27 = smov %s1625_s30  ;;  %22 = sbr.rel (!%p20_p10) target bundleno = 5 (0x5), region = 93 }
 0x2f8   : > { %s2053_s26 = smov %s2050_s9 }
 0x2f9   :  { %1198 = vsyncpa [#allocation3], 1 }
 0x2fa   :  { %1200 = vsyncpa [#allocation3 + $0x1], 1 }
 0x2fb   :  { %1201 = vsyncpa [#allocation4], 1 }
 0x2fc   :  { %1203 = vsyncpa [#allocation4 + $0x1], 1 }

</bundles_post_ra>
